<compile_context>
chip_gen: v7x
topology: tpu7x:2x2x1
jax: 0.10.0
libtpu: 0.0.40
codegen_flags: <defaults>
</compile_context>

<pallas_src>
import functools
import math

import jax
import jax.numpy as jnp
import numpy as np
from jax.experimental import pallas as pl
from jax.experimental.pallas import tpu as pltpu


# =============================================================================
# Init-time glue (numpy): reproduces shrink_kernel / dilate_kernel /
# kernel_generation.  This mirrors what the PyTorch module does in __init__
# (NOT in the forward hot path).
# =============================================================================
def _grid_sample_3d(inp, grid):
    """numpy F.grid_sample for 5-D input: trilinear, zeros padding, align_corners=False."""
    N, C, D, H, W = inp.shape
    gx, gy, gz = grid[..., 0], grid[..., 1], grid[..., 2]
    ix = ((gx + 1.0) * W - 1.0) / 2.0
    iy = ((gy + 1.0) * H - 1.0) / 2.0
    iz = ((gz + 1.0) * D - 1.0) / 2.0
    x0 = np.floor(ix).astype(np.int64); x1 = x0 + 1
    y0 = np.floor(iy).astype(np.int64); y1 = y0 + 1
    z0 = np.floor(iz).astype(np.int64); z1 = z0 + 1
    wx1 = ix - x0; wx0 = 1.0 - wx1
    wy1 = iy - y0; wy0 = 1.0 - wy1
    wz1 = iz - z0; wz0 = 1.0 - wz1

    n_idx = np.arange(N).reshape(N, 1, 1, 1, 1)
    c_idx = np.arange(C).reshape(1, C, 1, 1, 1)

    def gather(zc, yc, xc):
        valid = ((zc >= 0) & (zc < D) & (yc >= 0) & (yc < H)
                 & (xc >= 0) & (xc < W)).astype(inp.dtype)
        zcl = np.clip(zc, 0, D - 1)[:, None]
        ycl = np.clip(yc, 0, H - 1)[:, None]
        xcl = np.clip(xc, 0, W - 1)[:, None]
        vals = inp[n_idx, c_idx, zcl, ycl, xcl]
        return vals * valid[:, None]

    out = np.zeros((N, C) + gx.shape[1:], dtype=inp.dtype)
    for zc, wz in ((z0, wz0), (z1, wz1)):
        for yc, wy in ((y0, wy0), (y1, wy1)):
            for xc, wx in ((x0, wx0), (x1, wx1)):
                out += gather(zc, yc, xc) * (wz * wy * wx)[:, None]
    return out


def _shrink_kernel(kernel, up_scale):
    pad_in = int(math.ceil(up_scale ** 2)) * ((kernel.shape[2] - 1) // 2)
    pad_h = int(math.ceil(up_scale)) * ((kernel.shape[3] - 1) // 2)
    pad_w = int(math.ceil(up_scale)) * ((kernel.shape[4] - 1) // 2)
    padded = np.pad(kernel, ((0, 0), (0, 0), (pad_in, pad_in),
                             (pad_h, pad_h), (pad_w, pad_w)))
    delta = up_scale % 1
    if delta == 0:
        shrink_factor = 1.0
    else:
        shrink_factor = (kernel.shape[4] - 1) / (padded.shape[-1] - 1) * (up_scale + 1)
        shrink_factor = 1.5 * (shrink_factor - 0.5) ** 3 + 0.57
    gz = np.linspace(-1.0, 1.0, kernel.shape[2]) * shrink_factor ** 2
    gy = np.linspace(-1.0, 1.0, kernel.shape[3]) * shrink_factor
    gx = np.linspace(-1.0, 1.0, kernel.shape[4]) * shrink_factor
    Z, Y, X = np.meshgrid(gz, gy, gx, indexing="ij")
    grid = np.repeat(np.stack([X, Y, Z], axis=-1)[None], kernel.shape[0], axis=0)
    new_kernel = _grid_sample_3d(padded, grid)
    if kernel.shape[-1] - 2 * up_scale > 0:
        new_kernel = new_kernel * (kernel.shape[-1] ** 2 /
                                   ((kernel.shape[-1] - 2 * up_scale) ** 2 + 0.01))
    return new_kernel


def _dilate_kernel(kernel, dilation):
    if dilation == 0:
        return kernel
    delta = dilation % 1
    d_in = int(math.ceil(dilation ** 2))
    new_in = kernel.shape[2] + (kernel.shape[2] - 1) * d_in
    d_h = int(math.ceil(dilation))
    new_h = kernel.shape[3] + (kernel.shape[3] - 1) * d_h
    d_w = int(math.ceil(dilation))
    new_w = kernel.shape[4] + (kernel.shape[4] - 1) * d_h  # (sic) matches torch code
    new_kernel = np.zeros((kernel.shape[0], kernel.shape[1], new_in, new_h, new_w),
                          dtype=kernel.dtype)
    new_kernel[:, :, ::d_in + 1, ::d_h + 1, ::d_w + 1] = kernel
    if delta != 0:
        pad = (kernel.shape[4] - 1) // 2
        new_kernel = np.pad(new_kernel, ((0, 0), (0, 0), (pad, pad),
                                         (pad, pad), (pad, pad)))
        shrink_factor = ((new_kernel.shape[-1] - 1 - (kernel.shape[4] - 1) * delta) /
                         (new_kernel.shape[-1] - 1))
        gz = np.linspace(-1.0, 1.0, new_in) * shrink_factor ** 2
        gy = np.linspace(-1.0, 1.0, new_h) * shrink_factor
        gx = np.linspace(-1.0, 1.0, new_w) * shrink_factor
        Z, Y, X = np.meshgrid(gz, gy, gx, indexing="ij")
        grid = np.repeat(np.stack([X, Y, Z], axis=-1)[None], kernel.shape[0], axis=0)
        new_kernel = _grid_sample_3d(new_kernel, grid)
    return new_kernel[:, :, -kernel.shape[2]:]


def kernel_generation(weights, sout):
    out = []
    for s in range(sout):
        if s - sout // 2 < 0:
            nk = _shrink_kernel(weights, (sout // 2 - s) / 2)
        elif s - sout // 2 > 0:
            nk = _dilate_kernel(weights, (s - sout // 2) / 2)
        else:
            nk = weights
        nk = np.transpose(nk, (0, 2, 1, 3, 4))                       # .transpose(1, 2)
        nk = nk.reshape(nk.shape[0], -1, nk.shape[3], nk.shape[4])   # (Cout, Cin, KH, KW)
        out.append(np.ascontiguousarray(nk, dtype=np.float32))
    return out


# =============================================================================
# Pallas conv2d + ReLU hot path
# =============================================================================
def _round_up(x, m):
    return (x + m - 1) // m * m


def _conv2d_relu_kernel(x_hbm, w_ref, o_ref, x_vmem, dma_sem, *,
                        shifts, tile_l, cin_p, fold_taps):
    """One (batch, L-tile) grid step: double-buffered chunk DMA, taps, matmul, ReLU."""
    b = pl.program_id(0)
    lt = pl.program_id(1)
    nt = pl.num_programs(1)
    chunk = x_vmem.shape[-1]
    cout = w_ref.shape[0]
    slot = lt % 2

    def start_fetch(base, s):
        pltpu.make_async_copy(
            x_hbm.at[b, :, pl.ds(base, chunk)], x_vmem.at[s], dma_sem.at[s]).start()

    # Prime the pipeline for this batch's tile sweep.
    @pl.when(lt == 0)
    def _():
        start_fetch(0, 0)

    # Prefetch the next tile of the SAME batch into the other slot (keeps the
    # prefetch chain confined to one core even when the batch axis is sharded).
    @pl.when(lt + 1 < nt)
    def _():
        start_fetch(pl.multiple_of((lt + 1) * tile_l, 256), 1 - slot)

    # Wait for the current slot's chunk.
    pltpu.make_async_copy(
        x_hbm.at[b, :, pl.ds(0, chunk)], x_vmem.at[slot], dma_sem.at[slot]).wait()

    if fold_taps:
        # Small K: fold taps into one MXU contraction via static lane shifts.
        xmat = jnp.concatenate(
            [x_vmem[slot, :, pl.ds(s, tile_l)] for s in shifts], axis=0)
        acc = jnp.dot(w_ref[...], xmat, preferred_element_type=jnp.float32)
    else:
        # Large K: accumulate per tap directly from lane-shifted slices (no xmat
        # materialization -> no extra vld/vst pass and no VMEM blowup on v7x).
        acc = jnp.zeros((cout, tile_l), jnp.float32)
        for t, s in enumerate(shifts):
            acc = acc + jnp.dot(
                w_ref[:, t * cin_p:(t + 1) * cin_p],
                x_vmem[slot, :, pl.ds(s, tile_l)],
                preferred_element_type=jnp.float32)

    o_ref[0] = jnp.maximum(acc, 0.0).astype(o_ref.dtype)


def scale_group_conv2d_forward(x_nchw, kernels, level, *, tile_l=2048,
                               compute_dtype=jnp.bfloat16, fold_taps=None):
    """Pallas equivalent of Scale_GroupConv2d.forward(xx, level) -> (out, level)."""
    k = jnp.asarray(kernels[level])                          # (Cout, Cin, KH, KW)
    cout, cin, kh, kw = k.shape
    n, cin_x, h, w = x_nchw.shape
    assert cin_x == cin
    ph, pw = (kh - 1) // 2, (kw - 1) // 2                    # 'same' padding (F.conv2d)
    hp, wp = h + 2 * ph, w + 2 * pw
    hout = hp - kh + 1
    wout = wp - kw + 1
    ntaps = kh * kw

    itemsize = jnp.dtype(compute_dtype).itemsize
    sub = 16 if itemsize == 2 else 8          # bf16 needs 16-row sublane packing
    cin_p = _round_up(cin, sub)               # zero channels x zero weights -> no effect
    K = ntaps * cin_p
    if fold_taps is None:
        fold_taps = K <= 512

    # Flattened-spatial layout: output (y, x) lives at flat index y*wp + x (stride is
    # the *padded* width), so tap (dy, dx) is a constant shift dy*wp + dx.  Columns
    # x in [wout, wp) are garbage and dropped after the call.
    lout = hout * wp
    max_shift = (kh - 1) * wp + (kw - 1)

    # Tile sizing: multiple of 256, capped by a v7x-safe VMEM budget.
    tile_l = _round_up(max(256, min(tile_l, _round_up(lout, 256))), 256)

    def vmem_need(tl):
        ch = _round_up(tl + max_shift, 128)
        need = (2 * cin_p * ch * itemsize         # double-buffered activation scratch
                + 2 * cout * K * itemsize         # weight block (pipeline 2x)
                + 2 * cout * tl * 4               # output blocks (pipeline 2x)
                + cout * tl * 4)                  # f32 accumulator
        if fold_taps:
            need += K * tl * itemsize             # folded tap matrix temp
        return need

    VMEM_BUDGET = 40 << 20                        # conservative; fits v7x 64 MiB physical
    while tile_l > 256 and vmem_need(tile_l) > VMEM_BUDGET:
        tile_l -= 256

    num_tiles = pl.cdiv(lout, tile_l)
    lout_pad = num_tiles * tile_l
    chunk = _round_up(tile_l + max_shift, 128)    # lane-aligned tile + halo per DMA
    flat_needed = (num_tiles - 1) * tile_l + chunk

    # Single pad op (channels + spatial + extra tail rows), cast to compute dtype so the
    # padded HBM copy is half size in bf16; the reshape to flat layout is free.
    extra_flat = max(0, flat_needed - hp * wp)
    extra_rows = -(-extra_flat // wp)
    xp = jnp.pad(x_nchw.astype(compute_dtype),
                 ((0, 0), (0, cin_p - cin), (ph, ph + extra_rows), (pw, pw)))
    total_flat = (hp + extra_rows) * wp
    xf = xp.reshape(n, cin_p, total_flat)
    # TODO(synk): fold padding into the kernel (per-row strided DMAs from raw x +
    # in-VMEM halo memset) to remove this padded HBM copy entirely.

    # Weights -> (Cout, KH*KW*Cin_p), tap-major / channel-minor (matches tap slices).
    kp = jnp.pad(k.astype(compute_dtype), ((0, 0), (0, cin_p - cin), (0, 0), (0, 0)))
    w_flat = jnp.transpose(kp, (0, 2, 3, 1)).reshape(cout, K)

    shifts = tuple(dy * wp + dx for dy in range(kh) for dx in range(kw))

    vmem_limit = int(min(48 << 20, max(32 << 20, 2 * vmem_need(tile_l))))

    out_flat = pl.pallas_call(
        functools.partial(_conv2d_relu_kernel, shifts=shifts, tile_l=tile_l,
                          cin_p=cin_p, fold_taps=fold_taps),
        out_shape=jax.ShapeDtypeStruct((n, cout, lout_pad), jnp.float32),
        grid=(n, num_tiles),
        in_specs=[
            pl.BlockSpec(memory_space=pl.ANY),                    # activations, raw HBM
            pl.BlockSpec((cout, K), lambda b, t: (0, 0)),         # resident weights
        ],
        out_specs=pl.BlockSpec((1, cout, tile_l), lambda b, t: (b, 0, t)),
        scratch_shapes=[
            pltpu.VMEM((2, cin_p, chunk), compute_dtype),         # double-buffered chunk
            pltpu.SemaphoreType.DMA((2,)),
        ],
        compiler_params=pltpu.CompilerParams(
            # Batch axis "parallel" (v7x dual-TC sharding); tile axis "arbitrary" so
            # the manual double-buffer chain stays sequential on one core.
            dimension_semantics=("parallel", "arbitrary"),
            vmem_limit_bytes=vmem_limit),
    )(xf, w_flat)

    # Output is already NCHW (flat spatial, lane-dense); drop the garbage columns.
    # TODO(synk): consumers accepting the flat (hout, wp)-strided layout can skip this.
    out = out_flat[:, :, :hout * wp].reshape(n, cout, hout, wp)[:, :, :, :wout]
    return out, level


if __name__ == "__main__":
    in_channels, out_channels, kernel_size, sout = 4, 8, 3, 5
    batch, height, width = 2, 16, 16

    key = jax.random.PRNGKey(0)
    k_w, k_x = jax.random.split(key)
    stdv = math.sqrt(1.0 / (kernel_size * kernel_size * in_channels))
    weights = jax.random.uniform(
        k_w, (out_channels, 2, in_channels // 2, kernel_size, kernel_size),
        minval=-stdv, maxval=stdv, dtype=jnp.float32)
    # NOTE: the module also defines a zero-filled `bias` parameter, but forward()
    # calls F.conv2d without it, so it does not affect the output.

    kernels = [jnp.asarray(knl) for knl in kernel_generation(np.asarray(weights), sout)]
    x = jax.random.normal(k_x, (batch, in_channels, height, width), dtype=jnp.float32)

    # Test harness: snap inputs/weights to the bf16 grid (f32-representable) so both the
    # bf16-operand and f32-operand kernel paths are exactly comparable against an f32
    # HIGHEST-precision conv reference (only f32 summation order differs).
    x = x.astype(jnp.bfloat16).astype(jnp.float32)
    kernels = [kk.astype(jnp.bfloat16).astype(jnp.float32) for kk in kernels]

    def reference(xr, kr):
        ph, pw = (kr.shape[2] - 1) // 2, (kr.shape[3] - 1) // 2
        r = jax.lax.conv_general_dilated(
            xr, kr, window_strides=(1, 1), padding=((ph, ph), (pw, pw)),
            dimension_numbers=("NCHW", "OIHW", "NCHW"),
            precision=jax.lax.Precision.HIGHEST)
        return jnp.maximum(r, 0.0)

    # 1) Default bf16-operand path; tile_l=256 forces multiple tiles per batch so the
    #    double-buffered prefetch (prime + cross-tile fetch) is exercised.
    for level in range(sout):
        out, lvl = scale_group_conv2d_forward(x, kernels, level, tile_l=256)
        out = jax.block_until_ready(out)
        assert lvl == level
        ref = reference(x, kernels[level])
        assert out.shape == ref.shape, (out.shape, ref.shape)
        np.testing.assert_allclose(np.asarray(out), np.asarray(ref),
                                   rtol=1e-4, atol=1e-5)

    # 2) f32-operand path (exact module semantics), default tile sizing (single tile).
    lvl_mid = sout // 2
    out32, _ = scale_group_conv2d_forward(x, kernels, lvl_mid,
                                          compute_dtype=jnp.float32)
    out32 = jax.block_until_ready(out32)
    np.testing.assert_allclose(np.asarray(out32),
                               np.asarray(reference(x, kernels[lvl_mid])),
                               rtol=1e-4, atol=1e-5)

    # 3) Per-tap accumulation path (the large-Cin codepath) forced on.
    outpt, _ = scale_group_conv2d_forward(x, kernels, 0, tile_l=256, fold_taps=False)
    outpt = jax.block_until_ready(outpt)
    np.testing.assert_allclose(np.asarray(outpt),
                               np.asarray(reference(x, kernels[0])),
                               rtol=1e-4, atol=1e-5)

    print("KERNEL_OK")
</pallas_src>

<mosaic_0001>
module attributes {stable_mosaic.version = 11 : i64} {
  func.func @_conv2d_relu_kernel(%arg0: i32, %arg1: i32, %arg2: memref<2x16x648xbf16, #tpu.memory_space<any>>, %arg3: memref<8x144xbf16, #tpu.memory_space<vmem>>, %arg4: memref<1x8x256xf32, #tpu.memory_space<vmem>>, %arg5: memref<2x16x384xbf16, #tpu.memory_space<vmem>>, %arg6: memref<2x!tpu.dma_semaphore, #tpu.memory_space<semaphore_mem>>) attributes {dimension_semantics = [#tpu.dimension_semantics<parallel>, #tpu.dimension_semantics<arbitrary>], iteration_bounds = array<i64: 2, 2>, scalar_prefetch = 0 : i64, scratch_operands = 2 : i64, tpu.core_type = #tpu.core_type<tc>, window_params = [{}, {pipeline_mode = #tpu.pipeline_mode<synchronous>, transform_indices = @transform_1, window_bounds = array<i64: 8, 144>}, {transform_indices = @transform_2, window_bounds = array<i64: 1, 8, 256>}]} {
    %c2_i32 = arith.constant 2 : i32
    %c0_i32 = arith.constant 0 : i32
    %0 = arith.cmpi eq, %c2_i32, %c0_i32 : i32
    %c1_i32 = arith.constant 1 : i32
    %1 = arith.select %0, %c1_i32, %c2_i32 : i32
    %2 = arith.remsi %arg1, %1 : i32
    %c0_i32_0 = arith.constant 0 : i32
    %3 = arith.cmpi ne, %2, %c0_i32_0 : i32
    %c0_i32_1 = arith.constant 0 : i32
    %4 = arith.cmpi slt, %2, %c0_i32_1 : i32
    %c0_i32_2 = arith.constant 0 : i32
    %5 = arith.cmpi slt, %1, %c0_i32_2 : i32
    %6 = arith.xori %4, %5 : i1
    %7 = arith.andi %6, %3 : i1
    %8 = arith.addi %2, %1 : i32
    %9 = arith.select %7, %8, %2 : i32
    %c0_i32_3 = arith.constant 0 : i32
    %10 = arith.cmpi eq, %arg1, %c0_i32_3 : i32
    %11 = arith.extui %10 : i1 to i32
    %c0_i32_4 = arith.constant 0 : i32
    %12 = arith.cmpi ne, %11, %c0_i32_4 : i32
    scf.if %12 {
      %c0_i32_27 = arith.constant 0 : i32
      %c0_i32_28 = arith.constant 0 : i32
      %c0_i32_29 = arith.constant 0 : i32
      %c0_i32_30 = arith.constant 0 : i32
      %58 = tpu.memref_slice %arg2[%arg0, %c0_i32_29, %c0_i32_30] : memref<2x16x648xbf16, #tpu.memory_space<any>> -> memref<1x16x384xbf16, #tpu.memory_space<any>>
      %59 = tpu.memref_squeeze %58 : memref<1x16x384xbf16, #tpu.memory_space<any>> -> memref<16x384xbf16, #tpu.memory_space<any>>
      %c0_i32_31 = arith.constant 0 : i32
      %c0_i32_32 = arith.constant 0 : i32
      %60 = tpu.memref_slice %arg5[%c0_i32_27, %c0_i32_31, %c0_i32_32] : memref<2x16x384xbf16, #tpu.memory_space<vmem>> -> memref<1x16x384xbf16, #tpu.memory_space<vmem>>
      %61 = tpu.memref_squeeze %60 : memref<1x16x384xbf16, #tpu.memory_space<vmem>> -> memref<16x384xbf16, #tpu.memory_space<vmem>>
      %62 = tpu.memref_slice %arg6[%c0_i32_28] : memref<2x!tpu.dma_semaphore, #tpu.memory_space<semaphore_mem>> -> memref<1x!tpu.dma_semaphore, #tpu.memory_space<semaphore_mem>>
      %63 = tpu.memref_squeeze %62 : memref<1x!tpu.dma_semaphore, #tpu.memory_space<semaphore_mem>> -> memref<!tpu.dma_semaphore, #tpu.memory_space<semaphore_mem>>
      tpu.enqueue_dma source(%59 : memref<16x384xbf16, #tpu.memory_space<any>>) target(%61 : memref<16x384xbf16, #tpu.memory_space<vmem>>) target_semaphore(%63 : memref<!tpu.dma_semaphore, #tpu.memory_space<semaphore_mem>>)
    } else {
    }
    %c1_i32_5 = arith.constant 1 : i32
    %13 = arith.addi %arg1, %c1_i32_5 : i32
    %c2_i32_6 = arith.constant 2 : i32
    %14 = arith.cmpi slt, %13, %c2_i32_6 : i32
    %15 = arith.extui %14 : i1 to i32
    %c0_i32_7 = arith.constant 0 : i32
    %16 = arith.cmpi ne, %15, %c0_i32_7 : i32
    scf.if %16 {
      %c1_i32_27 = arith.constant 1 : i32
      %58 = arith.addi %arg1, %c1_i32_27 : i32
      %c256_i32 = arith.constant 256 : i32
      %59 = arith.muli %58, %c256_i32 : i32
      %60 = tpu.assume_multiple %59, 256 : i32
      %c1_i32_28 = arith.constant 1 : i32
      %61 = arith.subi %c1_i32_28, %9 : i32
      %c0_i32_29 = arith.constant 0 : i32
      %62 = tpu.memref_slice %arg2[%arg0, %c0_i32_29, %60] : memref<2x16x648xbf16, #tpu.memory_space<any>> -> memref<1x16x384xbf16, #tpu.memory_space<any>>
      %63 = tpu.memref_squeeze %62 : memref<1x16x384xbf16, #tpu.memory_space<any>> -> memref<16x384xbf16, #tpu.memory_space<any>>
      %c0_i32_30 = arith.constant 0 : i32
      %c0_i32_31 = arith.constant 0 : i32
      %64 = tpu.memref_slice %arg5[%61, %c0_i32_30, %c0_i32_31] : memref<2x16x384xbf16, #tpu.memory_space<vmem>> -> memref<1x16x384xbf16, #tpu.memory_space<vmem>>
      %65 = tpu.memref_squeeze %64 : memref<1x16x384xbf16, #tpu.memory_space<vmem>> -> memref<16x384xbf16, #tpu.memory_space<vmem>>
      %66 = tpu.memref_slice %arg6[%61] : memref<2x!tpu.dma_semaphore, #tpu.memory_space<semaphore_mem>> -> memref<1x!tpu.dma_semaphore, #tpu.memory_space<semaphore_mem>>
      %67 = tpu.memref_squeeze %66 : memref<1x!tpu.dma_semaphore, #tpu.memory_space<semaphore_mem>> -> memref<!tpu.dma_semaphore, #tpu.memory_space<semaphore_mem>>
      tpu.enqueue_dma source(%63 : memref<16x384xbf16, #tpu.memory_space<any>>) target(%65 : memref<16x384xbf16, #tpu.memory_space<vmem>>) target_semaphore(%67 : memref<!tpu.dma_semaphore, #tpu.memory_space<semaphore_mem>>)
    } else {
    }
    %c0_i32_8 = arith.constant 0 : i32
    %c0_i32_9 = arith.constant 0 : i32
    %17 = tpu.memref_slice %arg2[%arg0, %c0_i32_8, %c0_i32_9] : memref<2x16x648xbf16, #tpu.memory_space<any>> -> memref<1x16x384xbf16, #tpu.memory_space<any>>
    %18 = tpu.memref_squeeze %17 : memref<1x16x384xbf16, #tpu.memory_space<any>> -> memref<16x384xbf16, #tpu.memory_space<any>>
    %c0_i32_10 = arith.constant 0 : i32
    %c0_i32_11 = arith.constant 0 : i32
    %19 = tpu.memref_slice %arg5[%9, %c0_i32_10, %c0_i32_11] : memref<2x16x384xbf16, #tpu.memory_space<vmem>> -> memref<1x16x384xbf16, #tpu.memory_space<vmem>>
    %20 = tpu.memref_squeeze %19 : memref<1x16x384xbf16, #tpu.memory_space<vmem>> -> memref<16x384xbf16, #tpu.memory_space<vmem>>
    %21 = tpu.memref_slice %arg6[%9] : memref<2x!tpu.dma_semaphore, #tpu.memory_space<semaphore_mem>> -> memref<1x!tpu.dma_semaphore, #tpu.memory_space<semaphore_mem>>
    %22 = tpu.memref_squeeze %21 : memref<1x!tpu.dma_semaphore, #tpu.memory_space<semaphore_mem>> -> memref<!tpu.dma_semaphore, #tpu.memory_space<semaphore_mem>>
    tpu.wait_dma2 semaphore(%22 : memref<!tpu.dma_semaphore, #tpu.memory_space<semaphore_mem>>) src(%18 : memref<16x384xbf16, #tpu.memory_space<any>>) dst(%20 : memref<16x384xbf16, #tpu.memory_space<vmem>>)
    %23 = arith.index_cast %9 : i32 to index
    %c0 = arith.constant 0 : index
    %c0_12 = arith.constant 0 : index
    %24 = vector.load %arg5[%23, %c0, %c0_12] : memref<2x16x384xbf16, #tpu.memory_space<vmem>>, vector<1x16x256xbf16>
    %25 = vector.shape_cast %24 : vector<1x16x256xbf16> to vector<16x256xbf16>
    %26 = arith.index_cast %9 : i32 to index
    %c0_13 = arith.constant 0 : index
    %c1 = arith.constant 1 : index
    %27 = vector.load %arg5[%26, %c0_13, %c1] : memref<2x16x384xbf16, #tpu.memory_space<vmem>>, vector<1x16x256xbf16>
    %28 = vector.shape_cast %27 : vector<1x16x256xbf16> to vector<16x256xbf16>
    %29 = arith.index_cast %9 : i32 to index
    %c0_14 = arith.constant 0 : index
    %c2 = arith.constant 2 : index
    %30 = vector.load %arg5[%29, %c0_14, %c2] : memref<2x16x384xbf16, #tpu.memory_space<vmem>>, vector<1x16x256xbf16>
    %31 = vector.shape_cast %30 : vector<1x16x256xbf16> to vector<16x256xbf16>
    %32 = arith.index_cast %9 : i32 to index
    %c0_15 = arith.constant 0 : index
    %c18 = arith.constant 18 : index
    %33 = vector.load %arg5[%32, %c0_15, %c18] : memref<2x16x384xbf16, #tpu.memory_space<vmem>>, vector<1x16x256xbf16>
    %34 = vector.shape_cast %33 : vector<1x16x256xbf16> to vector<16x256xbf16>
    %35 = arith.index_cast %9 : i32 to index
    %c0_16 = arith.constant 0 : index
    %c19 = arith.constant 19 : index
    %36 = vector.load %arg5[%35, %c0_16, %c19] : memref<2x16x384xbf16, #tpu.memory_space<vmem>>, vector<1x16x256xbf16>
    %37 = vector.shape_cast %36 : vector<1x16x256xbf16> to vector<16x256xbf16>
    %38 = arith.index_cast %9 : i32 to index
    %c0_17 = arith.constant 0 : index
    %c20 = arith.constant 20 : index
    %39 = vector.load %arg5[%38, %c0_17, %c20] : memref<2x16x384xbf16, #tpu.memory_space<vmem>>, vector<1x16x256xbf16>
    %40 = vector.shape_cast %39 : vector<1x16x256xbf16> to vector<16x256xbf16>
    %41 = arith.index_cast %9 : i32 to index
    %c0_18 = arith.constant 0 : index
    %c36 = arith.constant 36 : index
    %42 = vector.load %arg5[%41, %c0_18, %c36] : memref<2x16x384xbf16, #tpu.memory_space<vmem>>, vector<1x16x256xbf16>
    %43 = vector.shape_cast %42 : vector<1x16x256xbf16> to vector<16x256xbf16>
    %44 = arith.index_cast %9 : i32 to index
    %c0_19 = arith.constant 0 : index
    %c37 = arith.constant 37 : index
    %45 = vector.load %arg5[%44, %c0_19, %c37] : memref<2x16x384xbf16, #tpu.memory_space<vmem>>, vector<1x16x256xbf16>
    %46 = vector.shape_cast %45 : vector<1x16x256xbf16> to vector<16x256xbf16>
    %47 = arith.index_cast %9 : i32 to index
    %c0_20 = arith.constant 0 : index
    %c38 = arith.constant 38 : index
    %48 = vector.load %arg5[%47, %c0_20, %c38] : memref<2x16x384xbf16, #tpu.memory_space<vmem>>, vector<1x16x256xbf16>
    %49 = vector.shape_cast %48 : vector<1x16x256xbf16> to vector<16x256xbf16>
    %50 = tpu.concatenate %25, %28, %31, %34, %37, %40, %43, %46, %49 in 0 : vector<16x256xbf16>, vector<16x256xbf16>, vector<16x256xbf16>, vector<16x256xbf16>, vector<16x256xbf16>, vector<16x256xbf16>, vector<16x256xbf16>, vector<16x256xbf16>, vector<16x256xbf16> -> vector<144x256xbf16>
    %c0_21 = arith.constant 0 : index
    %c0_22 = arith.constant 0 : index
    %51 = vector.load %arg3[%c0_21, %c0_22] : memref<8x144xbf16, #tpu.memory_space<vmem>>, vector<8x144xbf16>
    %cst = arith.constant dense<0.000000e+00> : vector<8x256xf32>
    %52 = tpu.matmul %51, %50, %cst {dimension_numbers = #tpu.dot_dimension_numbers<[1], [0], [0], [1], [0, 0, 1, 1], [], []>} : vector<8x144xbf16>, vector<144x256xbf16>, vector<8x256xf32> -> vector<8x256xf32>
    %cst_23 = arith.constant 0.000000e+00 : f32
    %53 = vector.broadcast %cst_23 : f32 to vector<8x256xf32>
    %54 = arith.maximumf %52, %53 : vector<8x256xf32>
    %c0_24 = arith.constant 0 : index
    %c0_25 = arith.constant 0 : index
    %c0_26 = arith.constant 0 : index
    %55 = vector.load %arg4[%c0_24, %c0_25, %c0_26] : memref<1x8x256xf32, #tpu.memory_space<vmem>>, vector<1x8x256xf32>
    %56 = vector.shape_cast %55 : vector<1x8x256xf32> to vector<8x256xf32>
    %57 = vector.shape_cast %54 : vector<8x256xf32> to vector<1x8x256xf32>
    tpu.vector_store %arg4[%c0_24, %c0_25, %c0_26], %57 {strides = array<i32>} : memref<1x8x256xf32, #tpu.memory_space<vmem>>, vector<1x8x256xf32>,
    return
  }
  func.func @transform_1(%arg0: i32, %arg1: i32) -> (i32, i32) {
    %c0_i32 = arith.constant 0 : i32
    %c0_i32_0 = arith.constant 0 : i32
    %c0_i32_1 = arith.constant 0 : i32
    return %c0_i32, %c0_i32_0 : i32, i32
  }
  func.func @transform_2(%arg0: i32, %arg1: i32) -> (i32, i32, i32) {
    %c0_i32 = arith.constant 0 : i32
    %c0_i32_0 = arith.constant 0 : i32
    return %arg0, %c0_i32, %arg1 : i32, i32, i32
  }
}

</mosaic_0001>

<bundles_post_ra>
// kernel: tpu_custom_call.1
= control target key start
LH: loop header
LB: loop body
LE: loop exit
PB: predicated region body
PF: predicated region fallthrough
CT: control target
= control target key end

     0   :  { %s1062_s0 = inlined_call_operand.hbm [shape: bf16[2,16,648], index: 0, kind: input, shape index: {}]   ;;  %s1063_s1 = inlined_call_operand.hbm [shape: bf16[8,144], index: 1, kind: input, shape index: {}]   ;;  %s1064_s2 = inlined_call_operand.hbm [shape: f32[2,8,512], index: 2, kind: output, shape index: {}]  }
   0x1   :  { %1073 = sst [smem:[#allocation20_spill]] %s1063_s1 }
   0x2   :  { %7 = vsyncpa [#allocation5], 0 }
   0x3   :  { %8 = vsyncpa [#allocation6], 0 }
   0x4   :  { %10 = vsyncpa [#allocation6 + $0x1], 0  ;;  %s824_s9 = smov 0   ;;  %s826_s10 = smov 0  }
   0x5   :  { %s828_s11 = smov 0   ;;  %s830_s12 = smov 0  }
   0x6   :  { %s832_s13 = smov 0   ;;  %s834_s14 = smov 0  }
   0x7   :  { %s836_s15 = smov 0   ;;  %s838_s16 = smov 0  }
   0x8 LB: > { %1074 = sst [smem:[#allocation17_spill]] %s779_s15  ;;  %s492_s17 = sadd.s32 4294967295, %s783_s16   ;;  %s783_s16 = sphi %s838_s16, %s16_s16   ;;  %s779_s15 = sphi %s836_s15, %s1091_s15   ;;  %s775_s14 = sphi %s834_s14, %s1096_s14   ;;  %s771_s13 = sphi %s832_s13, %s1089_s13   ;;  %s767_s12 = sphi %s830_s12, %s1095_s12   ;;  %s763_s11 = sphi %s828_s11, %s1094_s11   ;;  %s759_s10 = sphi %s826_s10, %s1093_s10   ;;  %s755_s9 = sphi %s824_s9, %s1092_s9  }
   0x9   : > { %s493_s18 = sadd.s32 4294967294, %s783_s16   ;;  %s25_s19 = sadd.s32 1, %s775_s14 }
   0xa   : > { %s28_s20 = sadd.s32 1, %s779_s15  ;;  %p26_p0 = scmp.ge.s32.totalorder %s25_s19, 2 }
   0xb   : > { %s58_s21 = sadd.s32 1, %s763_s11  ;;  %p68_p1 = scmp.ne.s32.totalorder %s763_s11, %s759_s10 }
   0xc   : > { %p69_p2 = scmp.eq.s32.totalorder %s492_s17, 3  ;;  %s1098_s19 = smov (%p26_p0, %s25_s19), 0 }
   0xd   : > { %1075 = sst [smem:[#allocation18_spill]] %s1098_s19  ;;  %s1100_s20 = smov (!%p26_p0, %s28_s20), %s779_s15 }
   0xe   : > { %s54_s22 = ssub.s32 %s775_s14, %s1098_s19  ;;  %p876_p3 = por %p69_p2, %p68_p1 }
   0xf   : > { %p30_p4 = scmp.ge.s32.totalorder %s1100_s20, 2  ;;  %p74_p5 = scmp.ne.s32.totalorder %s759_s10, %s755_s9 }
  0x10   : > { %s1076_s23 = scalar_select %p876_p3, 1, 0 }
  0x11   : > { %p75_p6 = scmp.eq.s32.totalorder %s493_s18, 3  ;;  %p494_p7 = scmp.ge.s32.totalorder %s783_s16, 1 }
  0x12   : > { %s1102_s20 = smov (%p30_p4, %s1100_s20), 0  ;;  %p82_p9 = scmp.lt.s32.totalorder %s783_s16, 5 }
  0x13   : > { %1077 = sst [smem:[#allocation19_spill]] %s1102_s20  ;;  %p885_p8 = por %p75_p6, %p74_p5 }
  0x14   : > { %s53_s25 = ssub.s32 %s779_s15, %s1102_s20  ;;  %p892_p10 = pnand %p494_p7, %p82_p9 }
  0x15   : > { %s1078_s24 = scalar_select %p885_p8, 1, 0 }
  0x16   : > { %s55_s26 = sor.u32 %s54_s22, %s53_s25  ;;  %p896_p12 = scmp.eq.s32.totalorder %s492_s17, 0 }
  0x17   : > { %s1079_s27 = scalar_select %p892_p10, 1, 0 }
  0x18   : > { %p56_p11 = scmp.eq.s32.totalorder %s55_s26, 0  ;;  %p553_p13 = pneg %p892_p10 }
  0x19   : > { %s1080_s28 = scalar_select %p896_p12, 1, 0 }
  0x1a   : > { %s903_s29 = scalar_select %p56_p11, %s763_s11, %s58_s21  }
  0x1b   : > { %s785_s30 = smov [#allocation4]   ;;  %p907_p0 = pnand %p896_p12, %p553_p13 }
  0x1c   : > { %s95_s3 = sshll.u32 %s785_s30, 4  ;;  %s1082_s1 = sld [smem:[#allocation20_spill]]  ;;  %s96_s3 = int_to_ptr.vmem [resolvable:$true] %s95_s3 }
  0x1d   : > { %p657_p2 = pneg %p907_p0 }
  0x22   : > { %s655_s7 = scalar_lea.hbm %s1082_s1, 128 }
  0x23   : > { %p656_p1 = scmp.ne.s32.totalorder %s1082_s1, %s655_s7  ;;  %p662_p6 = scmp.lt.u32.totalorder %s655_s7, %s1082_s1 }
  0x25   : > { %p658_p4 = pnand %p657_p2, %p656_p1 }
  0x27   : > { %p659_p5 = pneg %p658_p4 }
  0x29   : > { %p664_p7 = pnand %p662_p6, %p659_p5 }
  0x2b   : > { %667 = shalt.err (!%p664_p7)
}
  0x2c   : > { %s668_s22 = scalar_lea.vmem %s96_s3, 128  ;;  %p676_p8 = scmp.lt.s32.totalorder %s96_s3, %s96_s3 }
  0x2d   : > { %p669_p9 = scmp.ne.s32.totalorder %s96_s3, %s668_s22  ;;  %p677_p3 = scmp.lt.s32.totalorder %s668_s22, %s668_s22 }
  0x2f   : > { %p671_p11 = pnand %p669_p9, %p657_p2  ;;  %p678_p12 = por %p677_p3, %p676_p8 }
  0x31   : > { %p672_p13 = pneg %p671_p11 }
  0x33   : > { %p679_p10 = pnand %p678_p12, %p672_p13 }
  0x35   : > { %682 = shalt.err (!%p679_p10)
}
  0x36   : > { %556 = dma.hbm_to_vmem [thread:$0]  (!%p907_p0), %s1082_s1, 128, %s96_s3, [#allocation5]  }
  0x37   : > { %p1083_p1 = scmp.ne.s32.totalorder %s1079_s27, 0 }
  0x38   : > { %p1084_p4 = scmp.ne.s32.totalorder (!%p1083_p1), %s1080_s28, 0 }
  0x39   : > { %108 = sbr.rel (%p1083_p1) target bundleno = 500 (0x1f4), region = 24 }
  0x40   : > { %744 = dma.done.wait (%p1084_p4), [#allocation5], 128  }
  0x41   : > { %746 = vsyncadd (%p1084_p4), [#allocation5], 4294967168  ;;  %s1069_s30 = sand.u32 1, %s759_s10   ;;  %p125_p3 = scmp.lt.s32.totalorder %s767_s12, 0 }
  0x42   : > { %s498_s4 = sshll.u32 %s1069_s30, 4  ;;  %s126_s3 = ssub.s32 0, %s767_s12 }
  0x43   : > { %s499_s5 = smin.u32 %s767_s12, %s126_s3  ;;  %p563_p8 = scmp.eq.s32.totalorder %s767_s12, 0 }
  0x44   : > { %s128_s27 = sand.u32 1, %s499_s5   ;;  %s942_s28 = scalar_lea.vmem [#allocation7], %s498_s4 }
  0x45   : > { %s129_s6 = ssub.s32 0, %s128_s27 }
  0x46   : > { %s1104_s6 = smov (!%p125_p3, %s129_s6), %s128_s27 }
  0x47   : > { %p501_p10 = scmp.lt.s32.totalorder %s1104_s6, 0  ;;  %s135_s7 = sadd.s32 2, %s1104_s6 }
  0x49   : > { %s1106_s7 = smov (!%p501_p10, %s135_s7), %s1104_s6 }
  0x4a   : > { %s524_s8 = smul.u32 768, %s771_s13  ;;  %s786_s25 = smov [#allocation2]  }
  0x4b   : > { %s534_s17 = scalar_select %p563_p8, [#allocation0], [#allocation12] }
  0x4c   : > { %s143_s22 = scalar_lea.hbm %s1062_s0, %s524_s8  ;;  %s156_s26 = sshll.u32 %s786_s25, 4  ;;  %s157_s26 = int_to_ptr.vmem [resolvable:$true] %s156_s26 }
  0x4d   : > { %s148_s3 = sld [smem:[%s534_s17]]   ;;  %s787_s4 = smov 64  }
  0x4e   : > { %535 = sst [smem:[#allocation9]] (%p563_p8), %s787_s4  ;;  %s788_s5 = smov 128  }
  0x4f   : > { %536 = sst [smem:[#allocation9 + $0x1]] (%p563_p8), %s788_s5  ;;  %s789_s27 = smov 2  }
  0x50   : > { %537 = sst [smem:[#allocation9 + $0x2]] (%p563_p8), %s789_s27  ;;  %s790_s6 = smov 384  }
  0x51   : > { %538 = sst [smem:[#allocation9 + $0x3]] (%p563_p8), %s790_s6  ;;  %s791_s21 = smov 4  }
  0x52   : > { %539 = sst [smem:[#allocation9 + $0x4]] (%p563_p8), %s787_s4  ;;  %s792_s17 = smov [#allocation3]  }
  0x53   : > { %s504_s18 = sshll.u32 %s148_s3, 26  ;;  %540 = sst [smem:[#allocation9 + $0x5]] (%p563_p8), %s791_s21 }
  0x54   : > { %s505_s8 = sadd.s32 134217728, %s504_s18  ;;  %s793_s25 = smov [#allocation8]  }
  0x55   : > { %541 = dma.general (%p563_p8), %s143_s22, 384, %s157_s26, %s792_s17, %s793_s25, [#allocation9], %s505_s8, 0  }
  0x56   : > { %s173_s30 = sadd.s32 1, %s767_s12 }
  0x57   : > { %p965_p12 = scmp.lt.s32.totalorder %s173_s30, 2 }
  0x58   : > { %s525_s3 = sshll.u32 %s767_s12, 8  ;;  %s179_s4 = ssub.s32 1, %s1106_s7 }
  0x59   : > { %s526_s27 = sadd.s32 256, %s525_s3  ;;  %s182_s6 = smul.u32 12, %s771_s13 }
  0x5a   : > { %s180_s18 = sshra.s32 %s526_s27, 7  ;;  %s527_s21 = smul.u32 24, %s179_s4 }
  0x5b   : > { %s183_s22 = sadd.s32 %s182_s6, %s180_s18  ;;  %s794_s15 = smov 64  }
  0x5c   : > { %s508_s30 = sshll.u32 %s183_s22, 6  ;;  %s188_s1 = scalar_lea.vmem [#allocation2], %s527_s21 }
  0x5d   : > { %s185_s17 = scalar_lea.hbm %s1062_s0, %s508_s30  ;;  %s202_s20 = sshll.u32 %s188_s1, 4  ;;  %s203_s20 = int_to_ptr.vmem [resolvable:$true] %s202_s20 }
  0x5e   : > { %s543_s25 = scalar_select %p965_p12, [#allocation0], [#allocation13] }
  0x5f   : > { %544 = sst [smem:[#allocation11]] (%p965_p12), %s794_s15  ;;  %s795_s3 = smov 128  }
  0x60   : > { %s194_s19 = sld [smem:[%s543_s25]]   ;;  %s796_s27 = smov 2  }
  0x61   : > { %545 = sst [smem:[#allocation11 + $0x1]] (%p965_p12), %s795_s3  ;;  %s797_s6 = smov 384  }
  0x62   : > { %546 = sst [smem:[#allocation11 + $0x2]] (%p965_p12), %s796_s27  ;;  %s798_s21 = smov 4  }
  0x63   : > { %547 = sst [smem:[#allocation11 + $0x3]] (%p965_p12), %s797_s6  ;;  %s189_s22 = scalar_lea.sflag [#allocation3], %s179_s4 }
  0x64   : > { %548 = sst [smem:[#allocation11 + $0x4]] (%p965_p12), %s794_s15  ;;  %s799_s30 = smov [#allocation10]  }
  0x65   : > { %549 = sst [smem:[#allocation11 + $0x5]] (%p965_p12), %s798_s21  ;;  %s528_s26 = smul.u32 24, %s1106_s7 }
  0x66   : > { %s510_s18 = sshll.u32 %s194_s19, 26  ;;  %s222_s25 = scalar_lea.sflag [#allocation3], %s1106_s7 }
  0x67   : > { %s511_s1 = sadd.s32 134217728, %s510_s18  ;;  %s221_s8 = scalar_lea.vmem [#allocation2], %s528_s26 }
  0x68   : > { %550 = dma.general (%p965_p12), %s185_s17, 384, %s203_s20, %s189_s22, %s799_s30, [#allocation11], %s511_s1, 0  }
  0x69   : > { %747 = dma.done.wait %s222_s25, 384 }
  0x6a   : > { %748 = vsyncadd %s222_s25, 4294966912  ;;  %v228_v0 = vld [vmem:[%s221_s8 + $0x8] sm:$0xff]  ;;  %v227_v1 = vld [vmem:[%s221_s8] sm:$0xff]  ;;  %s800_s3 = smov 127   ;;  %s801_s15 = smov 126   ;;  %vm328_vm0 = vcmask 130048  }
  0x6b   : > { %235 = vrot.lane.b32.xlu0 %v228_v0, %s800_s3  ;;  %233 = vrot.lane.b32.xlu1 %v227_v1, %s800_s3  ;;  %v229_v2 = vld [vmem:[%s221_s8 + $0x10] sm:$0xff]  ;;  %s802_s19 = smov 110   ;;  %s803_s20 = smov 109   ;;  %vm239_vm1 = vcmask 1039360   ;;  %vm250_vm2 = vcmask 1031168   ;;  %vm261_vm3 = vcmask 900096  }
  0x6c   : > { %332 = vmatprep.subr.bf16.mxu0 %v228_v0  ;;  %s804_s7 = smov 108   ;;  %s805_s5 = smov 92   ;;  %v993_v3 = vld [vmem:[#allocation4] sm:$0xff]  ;;  %vm272_vm4 = vcmask 891904   ;;  %vm283_vm5 = vcmask 883712   ;;  %vm294_vm6 = vcmask 752640  }
  0x6d   : > { %333 = vmatpush1.bf16.msra.mxu0 %v227_v1  ;;  %v514_v4 = vcombine.high %v993_v3, %v993_v3  ;;  %s806_s4 = smov 91   ;;  %s807_s17 = smov 90   ;;  %vm305_vm7 = vcmask 744448   ;;  %vm316_vm8 = vcmask 736256   ;;  %v513_v45 = vcombine.low %v993_v3, %v993_v3 }
  0x6e   : > { %s517_s27 = sshll.u32 %s767_s12, 1  ;;  %s518_s6 = sshll.u32 %s771_s13, 2 }
  0x6f   : > { %237 = vrot.lane.b32.xlu0 %v229_v2, %s800_s3  ;;  %246 = vrot.lane.b32.xlu1 %v228_v0, %s801_s15  ;;  %s390_s18 = sadd.s32 %s518_s6, %s517_s27  ;;  %s394_s1 = sshll.u32 %s942_s28, 4  ;;  %s1007_s1 = int_to_ptr.vmem [resolvable:$true] %s394_s1 }
  0x70   : > { %515 = vmatprep.mubr.msk.bf16.mxu0 %vm328_vm0, %v514_v4  ;;  %s519_s21 = sshll.u32 %s390_s18, 7  ;;  %s1086_s12 = sand.u32 1, %s759_s10  }
  0x71   : > { %s1005_s26 = scalar_lea.hbm %s1064_s2, %s519_s21  ;;  %s378_s13 = scalar_lea.sflag [#allocation6], %s1086_s12 }
  0x72   : > { %s683_s8 = scalar_lea.vmem %s1007_s1, 256  ;;  %p1087_p2 = scmp.ne.s32.totalorder %s1076_s23, 0 }
  0x73   : > { %248 = vrot.lane.b32.xlu0 %v229_v2, %s801_s15  ;;  %244 = vrot.lane.b32.xlu1 %v227_v1, %s801_s15  ;;  %p684_p0 = scmp.ne.s32.totalorder %s1007_s1, %s683_s8  ;;  %s808_s25 = smov [#allocation7]  }
  0x74   : > { %s687_s3 = sshll.u32 %s808_s25, 4  ;;  %s688_s3 = int_to_ptr.vmem [resolvable:$false] %s687_s3 }
  0x75   : > { %p685_p5 = pnand %p684_p0, %p1087_p2  ;;  %s689_s15 = scalar_lea.vmem %s688_s3, 512 }
  0x76   : > { %p690_p7 = scmp.lt.s32.totalorder %s1007_s1, %s688_s3  ;;  %p691_p9 = scmp.lt.s32.totalorder %s689_s15, %s683_s8 }
  0x77   : > { %257 = vrot.lane.b32.xlu0 %v228_v0, %s802_s19  ;;  %259 = vrot.lane.b32.xlu1 %v229_v2, %s802_s19  ;;  %p686_p6 = pneg %p685_p5 }
  0x78   : > { %p692_p11 = por %p691_p9, %p690_p7 }
  0x7a   : > { %p693_p13 = pnand %p692_p11, %p686_p6 }
  0x7b   : > { %255 = vrot.lane.b32.xlu0 %v227_v1, %s802_s19  ;;  %268 = vrot.lane.b32.xlu1 %v228_v0, %s803_s20 }
  0x7f   : > { %270 = vrot.lane.b32.xlu0 %v229_v2, %s803_s20  ;;  %266 = vrot.lane.b32.xlu1 %v227_v1, %s803_s20 }
  0x83   : > { %279 = vrot.lane.b32.xlu0 %v228_v0, %s804_s7  ;;  %281 = vrot.lane.b32.xlu1 %v229_v2, %s804_s7 }
  0x87   : > { %277 = vrot.lane.b32.xlu0 %v227_v1, %s804_s7  ;;  %290 = vrot.lane.b32.xlu1 %v228_v0, %s805_s5 }
  0x8b   : > { %292 = vrot.lane.b32.xlu0 %v229_v2, %s805_s5  ;;  %288 = vrot.lane.b32.xlu1 %v227_v1, %s805_s5 }
  0x8f   : > { %301 = vrot.lane.b32.xlu0 %v228_v0, %s806_s4  ;;  %303 = vrot.lane.b32.xlu1 %v229_v2, %s806_s4 }
  0x93   : > { %299 = vrot.lane.b32.xlu0 %v227_v1, %s806_s4  ;;  %312 = vrot.lane.b32.xlu1 %v228_v0, %s807_s17 }
  0x97   : > { %314 = vrot.lane.b32.xlu0 %v229_v2, %s807_s17  ;;  %310 = vrot.lane.b32.xlu1 %v227_v1, %s807_s17 }
  0xdd   : > { %v236_v5 = vpop.permute.xlu0 %235  ;;  %v234_v6 = vpop.permute.xlu1 %233 }
  0xde   : > { %v240_v10 = vsel %vm239_vm1, %v234_v6, %v236_v5 }
  0xe1   : > { %v238_v7 = vpop.permute.xlu0 %237  ;;  %v247_v8 = vpop.permute.xlu1 %246 }
  0xe2   : > { %v241_v9 = vsel %vm239_vm1, %v236_v5, %v238_v7 }
  0xe3   : > { %334 = vmatprep.subr.bf16.mxu0 %v241_v9 }
  0xe4   : > { %335 = vmatpush1.bf16.msra.mxu0 %v240_v10 }
  0xe5   : > { %v249_v11 = vpop.permute.xlu0 %248  ;;  %v245_v12 = vpop.permute.xlu1 %244 }
  0xe6   : > { %v252_v13 = vsel %vm250_vm2, %v247_v8, %v249_v11  ;;  %v251_v14 = vsel %vm250_vm2, %v245_v12, %v247_v8 }
  0xe7   : > { %336 = vmatprep.subr.bf16.mxu0 %v252_v13 }
  0xe8   : > { %337 = vmatpush1.bf16.msra.mxu0 %v251_v14 }
  0xe9   : > { %v258_v15 = vpop.permute.xlu0 %257  ;;  %v260_v16 = vpop.permute.xlu1 %259 }
  0xea   : > { %v263_v17 = vsel %vm261_vm3, %v258_v15, %v260_v16 }
  0xeb   : > { %338 = vmatprep.subr.bf16.mxu0 %v263_v17 }
  0xed   : > { %v256_v18 = vpop.permute.xlu0 %255  ;;  %v269_v19 = vpop.permute.xlu1 %268 }
  0xee   : > { %v262_v20 = vsel %vm261_vm3, %v256_v18, %v258_v15 }
  0xef   : > { %339 = vmatpush1.bf16.msra.mxu0 %v262_v20 }
  0xf1   : > { %v271_v21 = vpop.permute.xlu0 %270  ;;  %v267_v22 = vpop.permute.xlu1 %266 }
  0xf2   : > { %v274_v23 = vsel %vm272_vm4, %v269_v19, %v271_v21  ;;  %v273_v24 = vsel %vm272_vm4, %v267_v22, %v269_v19 }
  0xf3   : > { %340 = vmatprep.subr.bf16.mxu0 %v274_v23 }
  0xf4   : > { %341 = vmatpush1.bf16.msra.mxu0 %v273_v24 }
  0xf5   : > { %v280_v25 = vpop.permute.xlu0 %279  ;;  %v282_v26 = vpop.permute.xlu1 %281 }
  0xf6   : > { %v285_v27 = vsel %vm283_vm5, %v280_v25, %v282_v26 }
  0xf7   : > { %342 = vmatprep.subr.bf16.mxu0 %v285_v27 }
  0xf9   : > { %v278_v28 = vpop.permute.xlu0 %277  ;;  %v291_v29 = vpop.permute.xlu1 %290 }
  0xfa   : > { %v284_v30 = vsel %vm283_vm5, %v278_v28, %v280_v25 }
  0xfb   : > { %343 = vmatpush1.bf16.msra.mxu0 %v284_v30 }
  0xfd   : > { %v293_v31 = vpop.permute.xlu0 %292  ;;  %v289_v32 = vpop.permute.xlu1 %288 }
  0xfe   : > { %v296_v33 = vsel %vm294_vm6, %v291_v29, %v293_v31  ;;  %v295_v34 = vsel %vm294_vm6, %v289_v32, %v291_v29 }
  0xff   : > { %344 = vmatprep.subr.bf16.mxu0 %v296_v33 }
 0x100   : > { %345 = vmatpush1.bf16.msra.mxu0 %v295_v34 }
 0x101   : > { %v302_v35 = vpop.permute.xlu0 %301  ;;  %v304_v36 = vpop.permute.xlu1 %303 }
 0x102   : > { %v307_v37 = vsel %vm305_vm7, %v302_v35, %v304_v36 }
 0x103   : > { %346 = vmatprep.subr.bf16.mxu0 %v307_v37 }
 0x105   : > { %v300_v38 = vpop.permute.xlu0 %299  ;;  %v313_v39 = vpop.permute.xlu1 %312 }
 0x106   : > { %v306_v40 = vsel %vm305_vm7, %v300_v38, %v302_v35 }
 0x107   : > { %347 = vmatpush1.bf16.msra.mxu0 %v306_v40 }
 0x109   : > { %v315_v41 = vpop.permute.xlu0 %314  ;;  %v311_v42 = vpop.permute.xlu1 %310 }
 0x10a   : > { %v318_v43 = vsel %vm316_vm8, %v313_v39, %v315_v41  ;;  %v317_v44 = vsel %vm316_vm8, %v311_v42, %v313_v39 }
 0x10b   : > { %348 = vmatprep.subr.bf16.mxu0 %v318_v43 }
 0x10c   : > { %349 = vmatpush1.bf16.msra.mxu0 %v317_v44 }
 0x10f   : > { %365 = vmatmul.mubr.bf16.vlgmr.msra.gmra.mrb[0].mxu0 %v513_v45 }
 0x1e2   : > { %v366_v46 = vpop.f32.mrb[0].mxu0 }
 0x1e3   : > { %v373_v47 = vmax.f32 %v366_v46, 0.0  ;;  %v368_v48 = vpop.f32.mrb[1].mxu0 }
 0x1e4   : > { %v374_v49 = vmax.f32 %v368_v48, 0.0  ;;  %v370_v50 = vpop.f32.mrb[2].mxu0 }
 0x1e5   : > { %375 = vst [vmem:[%s942_s28] sm:$0xff] %v373_v47  ;;  %v371_v51 = vpop.f32.mrb[3].mxu0 }
 0x1e6   : > { %376 = vst [vmem:[%s942_s28 + $0x8] sm:$0xff] %v374_v49 }
 0x1e7   : > { %696 = shalt.err (!%p693_p13)
}
 0x1e8   : > { %s697_s28 = scalar_lea.hbm %s1005_s26, 256  ;;  %s701_s7 = scalar_lea.hbm %s1064_s2, 1024 }
 0x1e9   : > { %p698_p1 = scmp.ne.s32.totalorder %s1005_s26, %s697_s28  ;;  %p702_p8 = scmp.lt.u32.totalorder %s1005_s26, %s1064_s2 }
 0x1ea   : > { %p703_p10 = scmp.lt.u32.totalorder %s701_s7, %s697_s28  ;;  %p705_p0 = scmp.lt.u32.totalorder %s697_s28, %s1005_s26 }
 0x1eb   : > { %p699_p4 = pnand %p698_p1, %p1087_p2 }
 0x1ec   : > { %p704_p12 = por %p703_p10, %p702_p8 }
 0x1ed   : > { %p700_p3 = pneg %p699_p4 }
 0x1ee   : > { %p706_p5 = por %p705_p0, %p704_p12 }
 0x1f0   : > { %p707_p6 = pnand %p706_p5, %p700_p3 }
 0x1f2   : > { %710 = shalt.err (!%p707_p6)
}
 0x1f3   : > { %551 = dma.vmem_to_hbm [thread:$0]  (%p1087_p2), %s1007_s1, 256, %s1005_s26, %s378_s13  }
 0x1f4 PF: > { %p565_p7 = scmp.ge.s32.totalorder %s783_s16, 2  ;;  %s406_s17 = sand.u32 1, %s755_s9  }
 0x1f5   : > { %p1088_p9 = scmp.ne.s32.totalorder %s1078_s24, 0  ;;  %s407_s27 = scalar_lea.sflag [#allocation6], %s406_s17 }
 0x1f7   : > { %p558_p11 = pnand %p565_p7, %p1088_p9 }
 0x1f9   : > { %750 = dma.done.wait (!%p558_p11), %s407_s27, 256  }
 0x1fa   : > { %752 = vsyncadd (!%p558_p11), %s407_s27, 4294967040  ;;  %s16_s16 = sadd.s32 1, %s783_s16   ;;  %s1089_s13 = sld [smem:[#allocation17_spill]] }
 0x1fb   : > { %p13_p13 = scmp.ge.s32.totalorder %s16_s16, 6   ;;  %s1090_s23 = sld [smem:[#allocation18_spill]] }
 0x1fc   : > { %s1091_s15 = sld [smem:[#allocation19_spill]]  ;;  %s1092_s9 = smov %s759_s10 }
 0x1fd   : > { %s1093_s10 = smov %s763_s11  ;;  %s1094_s11 = smov %s903_s29 }
 0x1fe   : > { %s1095_s12 = smov %s775_s14  ;;  %15 = sbr.rel (!%p13_p13) target bundleno = 8 (0x8), region = 86 }
 0x201   : > { %s1096_s14 = smov %s1090_s23 }
 0x205   :  { %412 = vsyncpa [#allocation5], 1 }
 0x206   :  { %414 = vsyncpa [#allocation5 + $0x1], 1 }
 0x207   :  { %415 = vsyncpa [#allocation6], 1 }
 0x208   :  { %417 = vsyncpa [#allocation6 + $0x1], 1 }
 0x209   :  { %418 = vsyncmov [#allocation3] }
 0x20c   :  { %s419_s24 = vpop.sfrf %418 }
 0x20d   :  { %p522_p2 = scmp.ne.s32.totalorder %s419_s24, 0 }
 0x20f   :  { %423 = shalt.err (%p522_p2)  }
 0x210   :  { %425 = vsyncmov [#allocation3 + $0x1] }
 0x213   :  { %s426_s29 = vpop.sfrf %425 }
 0x214   :  { %p523_p1 = scmp.ne.s32.totalorder %s426_s29, 0 }
 0x216   :  { %430 = shalt.err (%p523_p1)  }

</bundles_post_ra>
